<compile_context>
chip_gen: v7x
topology: tpu7x:2x2x1
jax: 0.10.0
libtpu: 0.0.40
codegen_flags: <defaults>
</compile_context>

<pallas_src>
import functools

import jax
import jax.numpy as jnp
from jax.experimental import pallas as pl
from jax.experimental.pallas import tpu as pltpu

LN_EPS = 1e-5
_VMEM_LIMIT = 48 * 1024 * 1024      # scoped VMEM limit passed to Mosaic (< v7x 64 MiB)
_VMEM_BUDGET = 40 * 1024 * 1024     # what tile sizing is allowed to consume


def _patch_merging_kernel(x_ref, wa_ref, wb_ref, cs_ref, bias_ref, o_ref):
    # x_ref  : (th, 2, Wp, 2C)  -- th output rows; axis 1 = even/odd input row
    # wa/wb  : (2C, Cp)         -- gamma-folded weight rows for the [x0|x2] / [x1|x3] halves
    # cs     : (1, Cp) f32      -- column sums of gamma (.) W
    # bias   : (1, Cp) f32      -- beta @ W
    # o_ref  : (th*Wp, Cp)
    th, _, wp, c2 = x_ref.shape
    m = th * wp

    x = x_ref[...]
    # a = even input row of each 2x2 patch -> channels [x0 | x2]
    # b = odd  input row of each 2x2 patch -> channels [x1 | x3]
    a = x[:, 0].reshape(m, c2)              # native dtype, fed straight to the MXU
    b = x[:, 1].reshape(m, c2)

    # Single-pass LayerNorm statistics over the (virtual) 4C axis, in f32.
    af = a.astype(jnp.float32)
    bf = b.astype(jnp.float32)
    inv_n = 1.0 / (2 * c2)
    s1 = jnp.sum(af, axis=-1, keepdims=True) + jnp.sum(bf, axis=-1, keepdims=True)
    s2 = (jnp.sum(af * af, axis=-1, keepdims=True)
          + jnp.sum(bf * bf, axis=-1, keepdims=True))
    mean = s1 * inv_n
    var = s2 * inv_n - mean * mean
    rstd = jax.lax.rsqrt(var + LN_EPS)

    # MXU matmuls on the raw activations (f32 accumulation).
    y = jnp.dot(a, wa_ref[...], preferred_element_type=jnp.float32)
    y = y + jnp.dot(b, wb_ref[...], preferred_element_type=jnp.float32)

    # ((x - mean) * rstd * gamma + beta) @ W  ==  (y - mean*colsum(gamma(.)W)) * rstd + beta@W
    o_ref[...] = ((y - mean * cs_ref[...]) * rstd + bias_ref[...]).astype(o_ref.dtype)


def _rows_per_step(rows, wp, c2, cp, in_item, w_item, out_item, target_tokens):
    """Output rows processed per grid step (grid = cdiv(rows, th), ragged OK)."""
    per_row = wp * (2 * 2 * c2 * in_item      # double-buffered input block
                    + 2 * cp * out_item       # double-buffered output block
                    + 4 * c2 * 4              # f32 temporaries on the 4C half-domain
                    + 3 * cp * 4)             # f32 y + epilogue temporaries
    fixed = (2 * 2 * c2 * cp * w_item         # double-buffered weight halves
             + 2 * 2 * cp * 4                 # cs / bias
             + (1 << 20))                     # misc headroom
    budget = max(_VMEM_BUDGET - fixed, per_row)
    th = min(budget // per_row, max(1, target_tokens // wp))
    # Keep >= 2 grid steps so v7x's two TensorCores both get work (and the
    # pipeline has something to overlap).
    th = min(th, max(1, -(-rows // 2)))
    return max(1, int(th))


@functools.partial(jax.jit, static_argnames=("target_tokens", "out_layout"))
def patch_merging_forward(x, gamma, beta, w_t, *, target_tokens=8192,
                          out_layout="NCHW"):
    """PatchMerging forward. x: (B, C, H, W); w_t: (4C, C) = reduction.weight.T."""
    B, C, H, W = x.shape
    assert H % 2 == 0 and W % 2 == 0, f"x size ({H}*{W}) are not even."
    Ho, Wo = H // 2, W // 2
    C2 = 2 * C
    Cout = w_t.shape[1]
    # Lane-pad the output only when it is narrower than one vreg; otherwise a
    # full-dim last axis is legal and avoids extra HBM write bytes.
    Cp = Cout if Cout >= 128 else 128
    # Sublane-align the token axis so the in-kernel reshape is free and the
    # flat output block (th*Wp, Cp) always has a sublane-aligned leading dim.
    Wp = ((Wo + 7) // 8) * 8

    # --- fold the LayerNorm affine into the linear weights (tiny, done once) ---
    f32 = jnp.float32
    w_f = w_t.astype(f32)                                  # (4C, Cout)
    g_f = gamma.astype(f32)
    b_f = beta.astype(f32)
    wg = (g_f[:, None] * w_f).reshape(4, C, Cout)          # gamma (.) W, by x0..x3
    mm_dtype = jnp.promote_types(x.dtype, w_t.dtype)       # no silent downcast
    wa = jnp.concatenate([wg[0], wg[2]], axis=0).astype(mm_dtype)  # even-row half
    wb = jnp.concatenate([wg[1], wg[3]], axis=0).astype(mm_dtype)  # odd-row half
    cs = (g_f @ w_f).reshape(1, Cout)                      # colsum(gamma (.) W)
    bias = (b_f @ w_f).reshape(1, Cout)                    # beta @ W
    if Cp != Cout:
        pad = ((0, 0), (0, Cp - Cout))
        wa = jnp.pad(wa, pad)
        wb = jnp.pad(wb, pad)
        cs = jnp.pad(cs, pad)
        bias = jnp.pad(bias, pad)

    # --- NCHW -> NHWC (one HBM copy); optional W pad fuses into it ---
    # TODO(synk): keep the surrounding model NHWC to drop both layout transposes.
    xh = jnp.transpose(x, (0, 2, 3, 1))                    # (B, H, W, C)
    if Wp != Wo:
        xh = jnp.pad(xh, ((0, 0), (0, 0), (0, 2 * Wp - W), (0, 0)))
    xv = xh.reshape(B * Ho, 2, Wp, C2)                     # contiguous view

    rows = B * Ho
    th = _rows_per_step(rows, Wp, C2, Cp,
                        jnp.dtype(x.dtype).itemsize,
                        jnp.dtype(mm_dtype).itemsize,
                        jnp.dtype(x.dtype).itemsize,
                        target_tokens)
    grid = (pl.cdiv(rows, th),)                            # ragged last block is fine

    out = pl.pallas_call(
        _patch_merging_kernel,
        out_shape=jax.ShapeDtypeStruct((rows * Wp, Cp), x.dtype),
        grid_spec=pltpu.PrefetchScalarGridSpec(
            num_scalar_prefetch=0,
            grid=grid,
            in_specs=[
                pl.BlockSpec((th, 2, Wp, C2), lambda i: (i, 0, 0, 0)),
                pl.BlockSpec((C2, Cp), lambda i: (0, 0)),
                pl.BlockSpec((C2, Cp), lambda i: (0, 0)),
                pl.BlockSpec((1, Cp), lambda i: (0, 0)),
                pl.BlockSpec((1, Cp), lambda i: (0, 0)),
            ],
            out_specs=pl.BlockSpec((th * Wp, Cp), lambda i: (i, 0)),
        ),
        compiler_params=pltpu.CompilerParams(
            dimension_semantics=("parallel",),
            vmem_limit_bytes=_VMEM_LIMIT),
    )(xv, wa, wb, cs, bias)

    # Drop W / lane padding; these slices fuse into the reshape / transpose.
    out = out.reshape(B, Ho, Wp, Cp)[:, :, :Wo, :Cout]
    if out_layout == "NHWC":
        return out                                         # (B, H/2, W/2, C)
    return jnp.transpose(out, (0, 3, 1, 2))                # (B, C, H/2, W/2)


def _reference_forward(x, gamma, beta, w_t):
    """Pure-JAX (f32) reference matching the PyTorch module semantics."""
    B, C, H, W = x.shape
    xh = jnp.transpose(x, (0, 2, 3, 1)).astype(jnp.float32)
    x0 = xh[:, 0::2, 0::2, :]
    x1 = xh[:, 1::2, 0::2, :]
    x2 = xh[:, 0::2, 1::2, :]
    x3 = xh[:, 1::2, 1::2, :]
    xc = jnp.concatenate([x0, x1, x2, x3], axis=-1)
    mean = jnp.mean(xc, axis=-1, keepdims=True)
    var = jnp.mean((xc - mean) ** 2, axis=-1, keepdims=True)
    xn = ((xc - mean) / jnp.sqrt(var + LN_EPS) * gamma.astype(jnp.float32)
          + beta.astype(jnp.float32))
    y = xn @ w_t.astype(jnp.float32)
    return jnp.transpose(y, (0, 3, 1, 2))


if __name__ == "__main__":
    key = jax.random.PRNGKey(0)
    k_x, k_w, k_g, k_b, k_x2 = jax.random.split(key, 5)

    B, C = 2, 32
    # Non-trivial gamma/beta so the affine-folding is actually exercised.
    gamma = 1.0 + 0.1 * jax.random.normal(k_g, (4 * C,), jnp.float32)
    beta = 0.05 * jax.random.normal(k_b, (4 * C,), jnp.float32)
    # nn.Linear(4*dim, dim, bias=False).weight has shape (dim, 4*dim);
    # we pass its transpose (4*dim, dim) so the kernel computes x @ w_t.
    w = jax.random.normal(k_w, (C, 4 * C), jnp.float32) * 0.02
    w_t = w.T

    # Case 1: f32, spatial 16x16 (Wo = 8, lane/sublane friendly), default tiles.
    H = W = 16
    x = jax.random.normal(k_x, (B, C, H, W), dtype=jnp.float32)
    ref = _reference_forward(x, gamma, beta, w_t)
    out = jax.block_until_ready(patch_merging_forward(x, gamma, beta, w_t))
    assert out.shape == (B, C, H // 2, W // 2), out.shape
    assert jnp.allclose(out, ref, atol=1e-4, rtol=1e-4), \
        float(jnp.max(jnp.abs(out - ref)))

    # Case 2: f32, spatial 14x14 (Wo = 7 -> W-padding path) with small tiles so
    # the cdiv grid has a ragged last block (14 rows, 3 rows/step -> 5 steps).
    H2 = W2 = 14
    x2 = jax.random.normal(k_x2, (B, C, H2, W2), dtype=jnp.float32)
    ref2 = _reference_forward(x2, gamma, beta, w_t)
    out2 = jax.block_until_ready(
        patch_merging_forward(x2, gamma, beta, w_t, target_tokens=24))
    assert out2.shape == (B, C, H2 // 2, W2 // 2), out2.shape
    assert jnp.allclose(out2, ref2, atol=1e-4, rtol=1e-4), \
        float(jnp.max(jnp.abs(out2 - ref2)))

    # Case 3: bf16 activations + weights (memory-bound fast path on v6e/v7x);
    # LayerNorm statistics stay f32 inside the kernel.
    xb = x.astype(jnp.bfloat16)
    wtb = w_t.astype(jnp.bfloat16)
    ref3 = _reference_forward(xb, gamma, beta, wtb)
    out3 = jax.block_until_ready(patch_merging_forward(xb, gamma, beta, wtb))
    assert jnp.allclose(out3.astype(jnp.float32), ref3, atol=5e-2, rtol=5e-2), \
        float(jnp.max(jnp.abs(out3.astype(jnp.float32) - ref3)))

    print("KERNEL_OK")
</pallas_src>

<mosaic_0001>
module attributes {stable_mosaic.version = 11 : i64} {
  func.func @_patch_merging_kernel(%arg0: i32, %arg1: memref<8x2x8x64xf32, #tpu.memory_space<vmem>>, %arg2: memref<64x128xf32, #tpu.memory_space<vmem>>, %arg3: memref<64x128xf32, #tpu.memory_space<vmem>>, %arg4: memref<1x128xf32, #tpu.memory_space<vmem>>, %arg5: memref<1x128xf32, #tpu.memory_space<vmem>>, %arg6: memref<64x128xf32, #tpu.memory_space<vmem>>) attributes {dimension_semantics = [#tpu.dimension_semantics<parallel>], iteration_bounds = array<i64: 2>, scalar_prefetch = 0 : i64, scratch_operands = 0 : i64, tpu.core_type = #tpu.core_type<tc>, window_params = [{transform_indices = @transform_0, window_bounds = array<i64: 8, 2, 8, 64>}, {pipeline_mode = #tpu.pipeline_mode<synchronous>, transform_indices = @transform_1, window_bounds = array<i64: 64, 128>}, {pipeline_mode = #tpu.pipeline_mode<synchronous>, transform_indices = @transform_2, window_bounds = array<i64: 64, 128>}, {pipeline_mode = #tpu.pipeline_mode<synchronous>, transform_indices = @transform_3, window_bounds = array<i64: 1, 128>}, {pipeline_mode = #tpu.pipeline_mode<synchronous>, transform_indices = @transform_4, window_bounds = array<i64: 1, 128>}, {transform_indices = @transform_5, window_bounds = array<i64: 64, 128>}]} {
    %c0 = arith.constant 0 : index
    %c0_0 = arith.constant 0 : index
    %c0_1 = arith.constant 0 : index
    %c0_2 = arith.constant 0 : index
    %0 = vector.load %arg1[%c0, %c0_0, %c0_1, %c0_2] : memref<8x2x8x64xf32, #tpu.memory_space<vmem>>, vector<8x2x8x64xf32>
    %1 = vector.extract_strided_slice %0 {offsets = [0, 0, 0, 0], sizes = [8, 1, 8, 64], strides = [1, 1, 1, 1]} : vector<8x2x8x64xf32> to vector<8x1x8x64xf32>
    %2 = vector.shape_cast %1 : vector<8x1x8x64xf32> to vector<8x8x64xf32>
    %3 = vector.shape_cast %2 : vector<8x8x64xf32> to vector<64x64xf32>
    %4 = vector.extract_strided_slice %0 {offsets = [0, 1, 0, 0], sizes = [8, 1, 8, 64], strides = [1, 1, 1, 1]} : vector<8x2x8x64xf32> to vector<8x1x8x64xf32>
    %5 = vector.shape_cast %4 : vector<8x1x8x64xf32> to vector<8x8x64xf32>
    %6 = vector.shape_cast %5 : vector<8x8x64xf32> to vector<64x64xf32>
    %cst = arith.constant dense<0.000000e+00> : vector<64xf32>
    %7 = vector.multi_reduction <add>, %3, %cst [1] : vector<64x64xf32> to vector<64xf32>
    %8 = vector.shape_cast %7 : vector<64xf32> to vector<64x1xf32>
    %cst_3 = arith.constant dense<0.000000e+00> : vector<64xf32>
    %9 = vector.multi_reduction <add>, %6, %cst_3 [1] : vector<64x64xf32> to vector<64xf32>
    %10 = vector.shape_cast %9 : vector<64xf32> to vector<64x1xf32>
    %11 = arith.addf %8, %10 : vector<64x1xf32>
    %12 = arith.mulf %3, %3 : vector<64x64xf32>
    %cst_4 = arith.constant dense<0.000000e+00> : vector<64xf32>
    %13 = vector.multi_reduction <add>, %12, %cst_4 [1] : vector<64x64xf32> to vector<64xf32>
    %14 = vector.shape_cast %13 : vector<64xf32> to vector<64x1xf32>
    %15 = arith.mulf %6, %6 : vector<64x64xf32>
    %cst_5 = arith.constant dense<0.000000e+00> : vector<64xf32>
    %16 = vector.multi_reduction <add>, %15, %cst_5 [1] : vector<64x64xf32> to vector<64xf32>
    %17 = vector.shape_cast %16 : vector<64xf32> to vector<64x1xf32>
    %18 = arith.addf %14, %17 : vector<64x1xf32>
    %cst_6 = arith.constant 7.812500e-03 : f32
    %19 = vector.broadcast %cst_6 : f32 to vector<64x1xf32>
    %20 = arith.mulf %11, %19 : vector<64x1xf32>
    %cst_7 = arith.constant 7.812500e-03 : f32
    %21 = vector.broadcast %cst_7 : f32 to vector<64x1xf32>
    %22 = arith.mulf %18, %21 : vector<64x1xf32>
    %23 = arith.mulf %20, %20 : vector<64x1xf32>
    %24 = arith.subf %22, %23 : vector<64x1xf32>
    %cst_8 = arith.constant 9.99999974E-6 : f32
    %25 = vector.broadcast %cst_8 : f32 to vector<64x1xf32>
    %26 = arith.addf %24, %25 : vector<64x1xf32>
    %27 = math.rsqrt %26 : vector<64x1xf32>
    %c0_9 = arith.constant 0 : index
    %c0_10 = arith.constant 0 : index
    %28 = vector.load %arg2[%c0_9, %c0_10] : memref<64x128xf32, #tpu.memory_space<vmem>>, vector<64x128xf32>
    %cst_11 = arith.constant dense<0.000000e+00> : vector<64x128xf32>
    %29 = tpu.matmul %3, %28, %cst_11 {dimension_numbers = #tpu.dot_dimension_numbers<[1], [0], [0], [1], [0, 0, 1, 1], [], []>} : vector<64x64xf32>, vector<64x128xf32>, vector<64x128xf32> -> vector<64x128xf32>
    %c0_12 = arith.constant 0 : index
    %c0_13 = arith.constant 0 : index
    %30 = vector.load %arg3[%c0_12, %c0_13] : memref<64x128xf32, #tpu.memory_space<vmem>>, vector<64x128xf32>
    %cst_14 = arith.constant dense<0.000000e+00> : vector<64x128xf32>
    %31 = tpu.matmul %6, %30, %cst_14 {dimension_numbers = #tpu.dot_dimension_numbers<[1], [0], [0], [1], [0, 0, 1, 1], [], []>} : vector<64x64xf32>, vector<64x128xf32>, vector<64x128xf32> -> vector<64x128xf32>
    %32 = arith.addf %29, %31 : vector<64x128xf32>
    %c0_15 = arith.constant 0 : index
    %c0_16 = arith.constant 0 : index
    %33 = vector.load %arg4[%c0_15, %c0_16] : memref<1x128xf32, #tpu.memory_space<vmem>>, vector<1x128xf32>
    %34 = vector.broadcast %20 : vector<64x1xf32> to vector<64x128xf32>
    %35 = vector.broadcast %33 : vector<1x128xf32> to vector<64x128xf32>
    %36 = arith.mulf %34, %35 : vector<64x128xf32>
    %37 = arith.subf %32, %36 : vector<64x128xf32>
    %38 = vector.broadcast %27 : vector<64x1xf32> to vector<64x128xf32>
    %39 = arith.mulf %37, %38 : vector<64x128xf32>
    %c0_17 = arith.constant 0 : index
    %c0_18 = arith.constant 0 : index
    %40 = vector.load %arg5[%c0_17, %c0_18] : memref<1x128xf32, #tpu.memory_space<vmem>>, vector<1x128xf32>
    %41 = vector.broadcast %40 : vector<1x128xf32> to vector<64x128xf32>
    %42 = arith.addf %39, %41 : vector<64x128xf32>
    %c0_19 = arith.constant 0 : index
    %c0_20 = arith.constant 0 : index
    %43 = vector.load %arg6[%c0_19, %c0_20] : memref<64x128xf32, #tpu.memory_space<vmem>>, vector<64x128xf32>
    tpu.vector_store %arg6[%c0_19, %c0_20], %42 {strides = array<i32>} : memref<64x128xf32, #tpu.memory_space<vmem>>, vector<64x128xf32>,
    return
  }
  func.func @transform_0(%arg0: i32) -> (i32, i32, i32, i32) {
    %c0_i32 = arith.constant 0 : i32
    %c0_i32_0 = arith.constant 0 : i32
    %c0_i32_1 = arith.constant 0 : i32
    %c0_i32_2 = arith.constant 0 : i32
    return %arg0, %c0_i32, %c0_i32_0, %c0_i32_1 : i32, i32, i32, i32
  }
  func.func @transform_1(%arg0: i32) -> (i32, i32) {
    %c0_i32 = arith.constant 0 : i32
    %c0_i32_0 = arith.constant 0 : i32
    %c0_i32_1 = arith.constant 0 : i32
    return %c0_i32, %c0_i32_0 : i32, i32
  }
  func.func @transform_2(%arg0: i32) -> (i32, i32) {
    %c0_i32 = arith.constant 0 : i32
    %c0_i32_0 = arith.constant 0 : i32
    %c0_i32_1 = arith.constant 0 : i32
    return %c0_i32, %c0_i32_0 : i32, i32
  }
  func.func @transform_3(%arg0: i32) -> (i32, i32) {
    %c0_i32 = arith.constant 0 : i32
    %c0_i32_0 = arith.constant 0 : i32
    %c0_i32_1 = arith.constant 0 : i32
    return %c0_i32, %c0_i32_0 : i32, i32
  }
  func.func @transform_4(%arg0: i32) -> (i32, i32) {
    %c0_i32 = arith.constant 0 : i32
    %c0_i32_0 = arith.constant 0 : i32
    %c0_i32_1 = arith.constant 0 : i32
    return %c0_i32, %c0_i32_0 : i32, i32
  }
  func.func @transform_5(%arg0: i32) -> (i32, i32) {
    %c0_i32 = arith.constant 0 : i32
    %c0_i32_0 = arith.constant 0 : i32
    return %arg0, %c0_i32 : i32, i32
  }
}

</mosaic_0001>

<bundles_post_ra>
// kernel: patch_merging_forward.1
= control target key start
LH: loop header
LB: loop body
LE: loop exit
PB: predicated region body
PF: predicated region fallthrough
CT: control target
= control target key end

     0   :  { %s1029_s18 = smov 0   ;;  %s1285_s0 = inlined_call_operand.vmem [shape: f32[16,2,8,64], index: 0, kind: input, shape index: {}]   ;;  %s1286_s1 = inlined_call_operand.vmem [shape: f32[64,128], index: 1, kind: input, shape index: {}]   ;;  %s1287_s2 = inlined_call_operand.vmem [shape: f32[64,128], index: 2, kind: input, shape index: {}]   ;;  %s1288_s3 = inlined_call_operand.vmem [shape: f32[1,128], index: 3, kind: input, shape index: {}]   ;;  %s1289_s4 = inlined_call_operand.vmem [shape: f32[1,128], index: 4, kind: input, shape index: {}]   ;;  %s1290_s5 = inlined_call_operand.vmem [shape: f32[128,128], index: 5, kind: output, shape index: {}]  }
   0x1 LB: > { %s808_s19 = sadd.s32 4294967295, %s997_s18   ;;  %p812_p0 = scmp.ge.s32.totalorder %s997_s18, 1  ;;  %s997_s18 = sphi %s1029_s18, %s15_s18  }
   0x2   : > { %p189_p1 = scmp.lt.s32.totalorder %s997_s18, 3 }
   0x4   : > { %p190_p2 = pnand %p812_p0, %p189_p1 }
   0x5   : > { %v432_v0 = vld [vmem:[%s1287_s2] sm:$0xff] (!%p190_p2)  ;;  %v433_v1 = vld [vmem:[%s1287_s2 + $0x8] sm:$0xff] (!%p190_p2)  ;;  %s813_s26 = sshll.u32 (!%p190_p2), %s808_s19, 3  ;;  %v434_v5 = vld [vmem:[%s1287_s2 + $0x10] sm:$0xff] (!%p190_p2)  ;;  %vm247_vm0 = vcmask (!%p190_p2), 523264  }
   0x6   : > { %193 = sbr.rel (%p190_p2) target bundleno = 260 (0x104), region = 40  ;;  %v424_v2 = vld [vmem:[%s1286_s1] sm:$0xff] (!%p190_p2)  ;;  %v927_v3 = vpack.c.bf16 (!%p190_p2), %v433_v1, %v432_v0  ;;  %v425_v4 = vld [vmem:[%s1286_s1 + $0x8] sm:$0xff] (!%p190_p2)  ;;  %v435_v6 = vld [vmem:[%s1287_s2 + $0x18] sm:$0xff] (!%p190_p2)  ;;  %p219_p3 = scmp.lt.s32.totalorder (!%p190_p2), %s813_s26, 15 }
   0x7   : > { %v943_v7 = vpack.c.bf16 (!%p190_p2), %v425_v4, %v424_v2  ;;  %v931_v8 = vpack.c.bf16 (!%p190_p2), %v435_v6, %v434_v5  ;;  %v426_v9 = vld [vmem:[%s1286_s1 + $0x10] sm:$0xff] (!%p190_p2)  ;;  %v427_v10 = vld [vmem:[%s1286_s1 + $0x18] sm:$0xff] (!%p190_p2)  ;;  %v436_v12 = vld [vmem:[%s1287_s2 + $0x20] sm:$0xff] (!%p190_p2) }
   0x8   : > { %928 = vmatprep.subr.bf16.mxu1 (!%p190_p2), %v927_v3  ;;  %v947_v11 = vpack.c.bf16 (!%p190_p2), %v427_v10, %v426_v9  ;;  %v437_v13 = vld [vmem:[%s1287_s2 + $0x28] sm:$0xff] (!%p190_p2)  ;;  %v428_v14 = vld [vmem:[%s1286_s1 + $0x20] sm:$0xff] (!%p190_p2)  ;;  %v438_v17 = vld [vmem:[%s1287_s2 + $0x30] sm:$0xff] (!%p190_p2) }
   0x9   : > { %944 = vmatprep.subr.bf16.mxu0 (!%p190_p2), %v943_v7  ;;  %930 = vmatpush3.bf16.msra.mxu1 (!%p190_p2), %v927_v3  ;;  %v429_v15 = vld [vmem:[%s1286_s1 + $0x28] sm:$0xff] (!%p190_p2)  ;;  %v935_v16 = vpack.c.bf16 (!%p190_p2), %v437_v13, %v436_v12  ;;  %v439_v18 = vld [vmem:[%s1287_s2 + $0x38] sm:$0xff] (!%p190_p2)  ;;  %v430_v26 = vld [vmem:[%s1286_s1 + $0x30] sm:$0xff] (!%p190_p2) }
   0xa   : > { %946 = vmatpush3.bf16.msra.mxu0 (!%p190_p2), %v943_v7  ;;  %932 = vmatprep.subr.bf16.mxu1 (!%p190_p2), %v931_v8  ;;  %v951_v21 = vpack.c.bf16 (!%p190_p2), %v429_v15, %v428_v14  ;;  %v431_v27 = vld [vmem:[%s1286_s1 + $0x38] sm:$0xff] (!%p190_p2)  ;;  %v939_v30 = vpack.c.bf16 (!%p190_p2), %v439_v18, %v438_v17 }
   0xb   : > { %948 = vmatprep.subr.bf16.mxu0 (!%p190_p2), %v947_v11  ;;  %v955_v32 = vpack.c.bf16 (!%p190_p2), %v431_v27, %v430_v26 }
   0xd   : > { %s1292_s26 = smov (!%p219_p3, %s813_s26), 15  ;;  %934 = vmatpush3.bf16.msra.mxu1 %v931_v8 }
   0xe   : > { %s838_s21 = sshll.u32 %s1292_s26, 4  ;;  %950 = vmatpush3.bf16.msra.mxu0 %v947_v11  ;;  %936 = vmatprep.subr.bf16.mxu1 %v935_v16  ;;  %s817_s11 = sshll.u32 %s1292_s26, 3 }
   0xf   : > { %s1079_s24 = scalar_lea.vmem %s1285_s0, %s838_s21  ;;  %952 = vmatprep.subr.bf16.mxu0 %v951_v21  ;;  %s1264_s15 = scalar_lea.vmem %s1290_s5, %s817_s11 }
  0x10   : > { %v1088_v19 = vld [vmem:[%s1079_s24 + $0x20] sm:$0xff]  ;;  %v1094_v22 = vld [vmem:[%s1079_s24 + $0x30] sm:$0xff]  ;;  %v1112_v28 = vld [vmem:[%s1079_s24 + $0x8] sm:$0xff] }
  0x11   : > { %v1091_v20 = vld [vmem:[%s1079_s24] sm:$0xff]  ;;  %v254_v23 = vsel %vm247_vm0, %v1088_v19, 0.0  ;;  %v1101_v25 = vld [vmem:[%s1079_s24 + $0x10] sm:$0xff]  ;;  %v257_v29 = vsel %vm247_vm0, %v1094_v22, 0.0  ;;  %887 = vmatprep.mubr.msk.f32.mxu1 %vm247_vm0, %v1112_v28  ;;  %938 = vmatpush3.bf16.msra.mxu1 %v935_v16  ;;  %v1132_v38 = vld [vmem:[%s1079_s24 + $0x18] sm:$0xff]  ;;  %v272_v46 = vsel %vm247_vm0, %v1112_v28, 0.0  ;;  %v307_v59 = vmul.f32 %v1094_v22, %v1094_v22 }
  0x12   : > { %v248_v24 = vsel %vm247_vm0, %v1091_v20, 0.0  ;;  %915 = vmatprep.mubr.msk.f32.mxu0 %vm247_vm0, %v1091_v20  ;;  %255 = vadd.xlane.f32.xlu1 %v254_v23  ;;  %v251_v31 = vsel %vm247_vm0, %v1101_v25, 0.0  ;;  %v1119_v33 = vld [vmem:[%s1079_s24 + $0x50] sm:$0xff]  ;;  %v1124_v34 = vld [vmem:[%s1079_s24 + $0x40] sm:$0xff]  ;;  %v1136_v40 = vld [vmem:[%s1079_s24 + $0x28] sm:$0xff]  ;;  %v275_v45 = vsel %vm247_vm0, %v1132_v38, 0.0  ;;  %v305_v55 = vmul.f32 %v1101_v25, %v1101_v25 }
  0x13   : > { %249 = vadd.xlane.f32.xlu0 %v248_v24  ;;  %954 = vmatpush3.bf16.msra.mxu0 %v951_v21  ;;  %v263_v35 = vsel %vm247_vm0, %v1119_v33, 0.0  ;;  %v260_v36 = vsel %vm247_vm0, %v1124_v34, 0.0  ;;  %v245_v37 = vld [vmem:[%s1079_s24 + $0x70] sm:$0xff]  ;;  %v243_v39 = vld [vmem:[%s1079_s24 + $0x60] sm:$0xff]  ;;  %v238_v43 = vld [vmem:[%s1079_s24 + $0x38] sm:$0xff]  ;;  %v278_v50 = vsel %vm247_vm0, %v1136_v40, 0.0  ;;  %v304_v57 = vmul.f32 %v1091_v20, %v1091_v20 }
  0x14   : > { %940 = vmatprep.subr.bf16.mxu1 %v939_v30  ;;  %956 = vmatprep.subr.bf16.mxu0 %v955_v32  ;;  %v269_v41 = vsel %vm247_vm0, %v245_v37, 0.0  ;;  %v266_v42 = vsel %vm247_vm0, %v243_v39, 0.0  ;;  %v1150_v44 = vld [vmem:[%s1079_s24 + $0x48] sm:$0xff]  ;;  %v242_v47 = vld [vmem:[%s1079_s24 + $0x58] sm:$0xff]  ;;  %v281_v49 = vsel %vm247_vm0, %v238_v43, 0.0  ;;  %v315_v58 = vsel %vm247_vm0, %v305_v55, 0.0 }
  0x15   : > { %942 = vmatpush3.bf16.msra.mxu1 %v939_v30  ;;  %v244_v48 = vld [vmem:[%s1079_s24 + $0x68] sm:$0xff]  ;;  %v246_v51 = vld [vmem:[%s1079_s24 + $0x78] sm:$0xff]  ;;  %v287_v52 = vsel %vm247_vm0, %v242_v47, 0.0  ;;  %v284_v53 = vsel %vm247_vm0, %v1150_v44, 0.0  ;;  %v312_v60 = vsel %vm247_vm0, %v304_v57, 0.0  ;;  %v306_v61 = vmul.f32 %v1088_v19, %v1088_v19 }
  0x16   : > { %258 = vadd.xlane.f32.xlu1 %v257_v29  ;;  %v293_v54 = vsel %vm247_vm0, %v246_v51, 0.0  ;;  %v290_v56 = vsel %vm247_vm0, %v244_v48, 0.0  ;;  %v321_v62 = vsel %vm247_vm0, %v307_v59, 0.0  ;;  %v309_v63 = vmul.f32 %v1119_v33, %v1119_v33 }
  0x17   : > { %252 = vadd.xlane.f32.xlu0 %v251_v31  ;;  %958 = vmatpush3.bf16.msra.mxu0 %v955_v32  ;;  %v318_v0 = vsel %vm247_vm0, %v306_v61, 0.0  ;;  %v308_v1 = vmul.f32 %v1124_v34, %v1124_v34  ;;  %v311_v3 = vmul.f32 %v245_v37, %v245_v37  ;;  %v310_v5 = vmul.f32 %v243_v39, %v243_v39 }
  0x18   : > { %888 = vmatmul.mubr.msk.f32.vlgmr.msra.gmra.mrb[0].mxu1 %vm247_vm0, %v1132_v38  ;;  %v327_v2 = vsel %vm247_vm0, %v309_v63, 0.0  ;;  %v337_v7 = vmul.f32 %v1132_v38, %v1132_v38  ;;  %v336_v9 = vmul.f32 %v1112_v28, %v1112_v28  ;;  %v339_v11 = vmul.f32 %v238_v43, %v238_v43 }
  0x19   : > { %890 = vmatprep.mubr.msk.f32.mxu1 %vm247_vm0, %v1136_v40  ;;  %v324_v4 = vsel %vm247_vm0, %v308_v1, 0.0  ;;  %v333_v6 = vsel %vm247_vm0, %v311_v3, 0.0  ;;  %v330_v8 = vsel %vm247_vm0, %v310_v5, 0.0  ;;  %v338_v13 = vmul.f32 %v1136_v40, %v1136_v40 }
  0x1a   : > { %264 = vadd.xlane.f32.xlu1 %v263_v35  ;;  %916 = vmatmul.mubr.msk.f32.vlgmr.msra.gmra.mrb[0].mxu0 %vm247_vm0, %v1101_v25  ;;  %v347_v10 = vsel %vm247_vm0, %v337_v7, 0.0  ;;  %v344_v12 = vsel %vm247_vm0, %v336_v9, 0.0  ;;  %v353_v14 = vsel %vm247_vm0, %v339_v11, 0.0  ;;  %v341_v15 = vmul.f32 %v242_v47, %v242_v47 }
  0x1b   : > { %261 = vadd.xlane.f32.xlu0 %v260_v36  ;;  %918 = vmatprep.mubr.msk.f32.mxu0 %vm247_vm0, %v1088_v19  ;;  %v350_v16 = vsel %vm247_vm0, %v338_v13, 0.0  ;;  %v340_v17 = vmul.f32 %v1150_v44, %v1150_v44  ;;  %v343_v19 = vmul.f32 %v246_v51, %v246_v51  ;;  %v342_v21 = vmul.f32 %v244_v48, %v244_v48 }
  0x1c   : > { %891 = vmatmul.mubr.msk.f32.gmra.mrb[2].mxu1 %vm247_vm0, %v238_v43  ;;  %v359_v18 = vsel %vm247_vm0, %v341_v15, 0.0 }
  0x1d   : > { %893 = vmatprep.mubr.msk.f32.mxu1 %vm247_vm0, %v1150_v44  ;;  %v356_v20 = vsel %vm247_vm0, %v340_v17, 0.0  ;;  %v362_v23 = vsel %vm247_vm0, %v342_v21, 0.0 }
  0x1e   : > { %270 = vadd.xlane.f32.xlu1 %v269_v41  ;;  %919 = vmatmul.mubr.msk.f32.gmra.mrb[2].mxu0 %vm247_vm0, %v1094_v22  ;;  %v365_v22 = vsel %vm247_vm0, %v343_v19, 0.0 }
  0x1f   : > { %267 = vadd.xlane.f32.xlu0 %v266_v42  ;;  %921 = vmatprep.mubr.msk.f32.mxu0 %vm247_vm0, %v1124_v34 }
  0x20   : > { %894 = vmatmul.mubr.msk.f32.gmra.mrb[4].mxu1 %vm247_vm0, %v242_v47 }
  0x21   : > { %896 = vmatprep.mubr.msk.f32.mxu1 %vm247_vm0, %v244_v48 }
  0x22   : > { %276 = vadd.xlane.f32.xlu1 %v275_v45  ;;  %922 = vmatmul.mubr.msk.f32.gmra.mrb[4].mxu0 %vm247_vm0, %v1119_v33 }
  0x23   : > { %273 = vadd.xlane.f32.xlu0 %v272_v46  ;;  %924 = vmatprep.mubr.msk.f32.mxu0 %vm247_vm0, %v243_v39 }
  0x24   : > { %897 = vmatmul.mubr.msk.f32.gmra.mrb[6].mxu1 %vm247_vm0, %v246_v51 }
  0x26   : > { %282 = vadd.xlane.f32.xlu1 %v281_v49  ;;  %925 = vmatmul.mubr.msk.f32.gmra.mrb[6].mxu0 %vm247_vm0, %v245_v37 }
  0x27   : > { %279 = vadd.xlane.f32.xlu0 %v278_v50 }
  0x2a   : > { %288 = vadd.xlane.f32.xlu1 %v287_v52 }
  0x2b   : > { %285 = vadd.xlane.f32.xlu0 %v284_v53 }
  0x2e   : > { %294 = vadd.xlane.f32.xlu1 %v293_v54 }
  0x2f   : > { %291 = vadd.xlane.f32.xlu0 %v290_v56 }
  0x32   : > { %316 = vadd.xlane.f32.xlu1 %v315_v58 }
  0x33   : > { %313 = vadd.xlane.f32.xlu0 %v312_v60 }
  0x36   : > { %322 = vadd.xlane.f32.xlu1 %v321_v62 }
  0x37   : > { %319 = vadd.xlane.f32.xlu0 %v318_v0 }
  0x3a   : > { %328 = vadd.xlane.f32.xlu1 %v327_v2 }
  0x3b   : > { %325 = vadd.xlane.f32.xlu0 %v324_v4 }
  0x3e   : > { %334 = vadd.xlane.f32.xlu1 %v333_v6 }
  0x3f   : > { %331 = vadd.xlane.f32.xlu0 %v330_v8 }
  0x42   : > { %348 = vadd.xlane.f32.xlu1 %v347_v10 }
  0x43   : > { %345 = vadd.xlane.f32.xlu0 %v344_v12 }
  0x46   : > { %354 = vadd.xlane.f32.xlu1 %v353_v14 }
  0x47   : > { %351 = vadd.xlane.f32.xlu0 %v350_v16 }
  0x4a   : > { %360 = vadd.xlane.f32.xlu1 %v359_v18 }
  0x4b   : > { %357 = vadd.xlane.f32.xlu0 %v356_v20 }
  0x4e   : > { %366 = vadd.xlane.f32.xlu1 %v365_v22 }
  0x4f   : > { %363 = vadd.xlane.f32.xlu0 %v362_v23 }
  0x9f   : > { %v256_v24 = vpop.xlane.xlu1 %255 }
  0xa0   : > { %v250_v25 = vpop.xlane.xlu0 %249 }
  0xa3   : > { %v259_v26 = vpop.xlane.xlu1 %258 }
  0xa4   : > { %v253_v27 = vpop.xlane.xlu0 %252 }
  0xa7   : > { %v265_v28 = vpop.xlane.xlu1 %264 }
  0xa8   : > { %v262_v29 = vpop.xlane.xlu0 %261 }
  0xab   : > { %v271_v30 = vpop.xlane.xlu1 %270 }
  0xac   : > { %v268_v31 = vpop.xlane.xlu0 %267 }
  0xaf   : > { %v277_v32 = vpop.xlane.xlu1 %276 }
  0xb0   : > { %v274_v33 = vpop.xlane.xlu0 %273  ;;  %v297_v51 = vadd.f32 %v277_v32, %v253_v27 }
  0xb1   : > { %v296_v53 = vadd.f32 %v274_v33, %v250_v25 }
  0xb2   : > { %v377_v56 = vmul.f32 0.0078125, %v297_v51 }
  0xb3   : > { %v283_v34 = vpop.xlane.xlu1 %282  ;;  %v1217_v58 = vmul.f32 0.0078125, %v296_v53 }
  0xb4   : > { %v280_v35 = vpop.xlane.xlu0 %279  ;;  %v299_v57 = vadd.f32 %v283_v34, %v259_v26  ;;  %v393_v2 = vmul.f32 %v377_v56, %v377_v56 }
  0xb5   : > { %v298_v59 = vadd.f32 %v280_v35, %v256_v24  ;;  %v392_v5 = vmul.f32 %v1217_v58, %v1217_v58 }
  0xb6   : > { %v1219_v3 = vmul.f32 0.0078125, %v299_v57 }
  0xb7   : > { %v289_v36 = vpop.xlane.xlu1 %288  ;;  %v1223_v6 = vmul.f32 0.0078125, %v298_v59 }
  0xb8   : > { %v286_v37 = vpop.xlane.xlu0 %285  ;;  %v301_v4 = vadd.f32 %v289_v36, %v265_v28  ;;  %v395_v15 = vmul.f32 %v1219_v3, %v1219_v3 }
  0xb9   : > { %v300_v7 = vadd.f32 %v286_v37, %v262_v29  ;;  %v394_v19 = vmul.f32 %v1223_v6, %v1223_v6 }
  0xba   : > { %v1227_v16 = vmul.f32 0.0078125, %v301_v4 }
  0xbb   : > { %v295_v38 = vpop.xlane.xlu1 %294  ;;  %v1231_v20 = vmul.f32 0.0078125, %v300_v7 }
  0xbc   : > { %v292_v39 = vpop.xlane.xlu0 %291  ;;  %v303_v17 = vadd.f32 %v295_v38, %v271_v30  ;;  %v397_v32 = vmul.f32 %v1227_v16, %v1227_v16 }
  0xbd   : > { %v302_v21 = vadd.f32 %v292_v39, %v268_v31  ;;  %v396_v30 = vmul.f32 %v1231_v20, %v1231_v20 }
  0xbe   : > { %v1235_v33 = vmul.f32 0.0078125, %v303_v17 }
  0xbf   : > { %v317_v40 = vpop.xlane.xlu1 %316  ;;  %v1239_v34 = vmul.f32 0.0078125, %v302_v21 }
  0xc0   : > { %v314_v41 = vpop.xlane.xlu0 %313 }
  0xc3   : > { %v323_v42 = vpop.xlane.xlu1 %322 }
  0xc4   : > { %v320_v43 = vpop.xlane.xlu0 %319 }
  0xc7   : > { %v329_v44 = vpop.xlane.xlu1 %328 }
  0xc8   : > { %v326_v45 = vpop.xlane.xlu0 %325 }
  0xcb   : > { %v335_v46 = vpop.xlane.xlu1 %334 }
  0xcc   : > { %v332_v47 = vpop.xlane.xlu0 %331 }
  0xcf   : > { %v349_v48 = vpop.xlane.xlu1 %348 }
  0xd0   : > { %v346_v49 = vpop.xlane.xlu0 %345  ;;  %v369_v54 = vadd.f32 %v349_v48, %v317_v40  ;;  %v399_v40 = vmul.f32 %v1235_v33, %v1235_v33 }
  0xd1   : > { %v368_v55 = vadd.f32 %v346_v49, %v314_v41  ;;  %v398_v41 = vmul.f32 %v1239_v34, %v1239_v34 }
  0xd2   : > { %v385_v61 = vmul.f32 0.0078125, %v369_v54 }
  0xd3   : > { %v355_v50 = vpop.xlane.xlu1 %354  ;;  %v384_v0 = vmul.f32 0.0078125, %v368_v55 }
  0xd4   : > { %v352_v52 = vpop.xlane.xlu0 %351  ;;  %v371_v62 = vadd.f32 %v355_v50, %v323_v42  ;;  %v401_v8 = vsub.f32 %v385_v61, %v393_v2 }
  0xd5   : > { %v370_v1 = vadd.f32 %v352_v52, %v320_v43  ;;  %v400_v11 = vsub.f32 %v384_v0, %v392_v5 }
  0xd6   : > { %v387_v9 = vmul.f32 0.0078125, %v371_v62  ;;  %v409_v22 = vadd.f32 1e-05, %v401_v8  ;;  %v835_v62 = vld [vmem:[%s1289_s4] ss:$0 sm:$0xff] }
  0xd7   : > { %v361_v60 = vpop.xlane.xlu1 %360  ;;  %v386_v12 = vmul.f32 0.0078125, %v370_v1  ;;  %v408_v26 = vadd.f32 1e-05, %v400_v11 }
  0xd8   : > { %v358_v63 = vpop.xlane.xlu0 %357  ;;  %v373_v10 = vadd.f32 %v361_v60, %v329_v44  ;;  %v403_v23 = vsub.f32 %v387_v9, %v395_v15  ;;  %975 = vrsqrt.f32 %v409_v22  ;;  %v1248_v44 = vld [vmem:[%s1288_s3] ss:$0 sm:$0xff] }
  0xd9   : > { %v372_v13 = vadd.f32 %v358_v63, %v326_v45  ;;  %v402_v27 = vsub.f32 %v386_v12, %v394_v19  ;;  %977 = vrsqrt.f32 %v408_v26  ;;  %v706_v50 = vmul.f32 %v1248_v44, %v377_v56 }
  0xda   : > { %v389_v24 = vmul.f32 0.0078125, %v373_v10  ;;  %v411_v31 = vadd.f32 1e-05, %v403_v23  ;;  %v705_v53 = vmul.f32 %v1248_v44, %v1217_v58  ;;  %v708_v58 = vmul.f32 %v1248_v44, %v1219_v3 }
  0xdb   : > { %v367_v14 = vpop.xlane.xlu1 %366  ;;  %v388_v28 = vmul.f32 0.0078125, %v372_v13  ;;  %v410_v37 = vadd.f32 1e-05, %v402_v27  ;;  %v707_v7 = vmul.f32 %v1248_v44, %v1223_v6  ;;  %v709_v23 = vmul.f32 %v1248_v44, %v1231_v20 }
  0xdc   : > { %v364_v18 = vpop.xlane.xlu0 %363  ;;  %v375_v25 = vadd.f32 %v367_v14, %v335_v46  ;;  %v405_v35 = vsub.f32 %v389_v24, %v397_v32  ;;  %979 = vrsqrt.f32 %v411_v31 }
  0xdd   : > { %v374_v29 = vadd.f32 %v364_v18, %v332_v47  ;;  %v404_v38 = vsub.f32 %v388_v28, %v396_v30  ;;  %981 = vrsqrt.f32 %v410_v37  ;;  %v710_v18 = vmul.f32 %v1248_v44, %v1227_v16 }
  0xde   : > { %v391_v36 = vmul.f32 0.0078125, %v375_v25  ;;  %v413_v42 = vadd.f32 1e-05, %v405_v35 }
  0xdf   : > { %v390_v39 = vmul.f32 0.0078125, %v374_v29  ;;  %v412_v45 = vadd.f32 1e-05, %v404_v38 }
  0xe0   : > { %v407_v43 = vsub.f32 %v391_v36, %v399_v40  ;;  %983 = vrsqrt.f32 %v413_v42  ;;  %v712_v36 = vmul.f32 %v1248_v44, %v1235_v33 }
  0xe1   : > { %v406_v46 = vsub.f32 %v390_v39, %v398_v41  ;;  %985 = vrsqrt.f32 %v412_v45  ;;  %v711_v39 = vmul.f32 %v1248_v44, %v1239_v34 }
  0xe2   : > { %v415_v54 = vadd.f32 1e-05, %v407_v43  ;;  %v976_v61 = vpop.eup %975 }
  0xe3   : > { %v414_v57 = vadd.f32 1e-05, %v406_v46  ;;  %v978_v1 = vpop.eup %977 }
  0xe4   : > { %987 = vrsqrt.f32 %v415_v54 }
  0xe5   : > { %989 = vrsqrt.f32 %v414_v57 }
  0xe6   : > { %v980_v12 = vpop.eup %979 }
  0xe7   : > { %v982_v6 = vpop.eup %981 }
  0xea   : > { %v984_v29 = vpop.eup %983 }
  0xeb   : > { %v889_v47 = vpop.f32.mrb[0].mxu1  ;;  %v986_v35 = vpop.eup %985 }
  0xec   : > { %v530_v49 = vpop.f32.mrb[1].mxu1 }
  0xed   : > { %v917_v48 = vpop.f32.mrb[0].mxu0 }
  0xee   : > { %v665_v51 = vadd.f32 %v917_v48, %v889_v47  ;;  %v659_v52 = vpop.f32.mrb[1].mxu0  ;;  %v988_v45 = vpop.eup %987 }
  0xef   : > { %v660_v55 = vadd.f32 %v659_v52, %v530_v49  ;;  %v892_v60 = vpop.f32.mrb[2].mxu1  ;;  %v990_v48 = vpop.eup %989 }
  0xf0   : > { %v714_v59 = vsub.f32 %v665_v51, %v706_v50  ;;  %v540_v0 = vpop.f32.mrb[3].mxu1 }
  0xf1   : > { %v713_v63 = vsub.f32 %v660_v55, %v705_v53  ;;  %v920_v56 = vpop.f32.mrb[2].mxu0 }
  0xf2   : > { %v722_v2 = vmul.f32 %v976_v61, %v714_v59  ;;  %v675_v4 = vadd.f32 %v920_v56, %v892_v60  ;;  %v669_v5 = vpop.f32.mrb[3].mxu0 }
  0xf3   : > { %v721_v8 = vmul.f32 %v978_v1, %v713_v63  ;;  %v670_v9 = vadd.f32 %v669_v5, %v540_v0  ;;  %v895_v3 = vpop.f32.mrb[4].mxu1 }
  0xf4   : > { %v737_v10 = vadd.f32 %v835_v62, %v722_v2  ;;  %v716_v11 = vsub.f32 %v675_v4, %v708_v58  ;;  %v550_v17 = vpop.f32.mrb[5].mxu1 }
  0xf5   : > { %v736_v13 = vadd.f32 %v835_v62, %v721_v8  ;;  %v715_v14 = vsub.f32 %v670_v9, %v707_v7  ;;  %v923_v15 = vpop.f32.mrb[4].mxu0 }
  0xf6   : > { %745 = vst [vmem:[%s1264_s15 + $0x8] sm:$0xff] %v737_v10  ;;  %v724_v19 = vmul.f32 %v980_v12, %v716_v11  ;;  %v685_v21 = vadd.f32 %v923_v15, %v895_v3  ;;  %v679_v22 = vpop.f32.mrb[5].mxu0 }
  0xf7   : > { %744 = vst [vmem:[%s1264_s15] sm:$0xff] %v736_v13  ;;  %v723_v24 = vmul.f32 %v982_v6, %v715_v14  ;;  %v680_v25 = vadd.f32 %v679_v22, %v550_v17  ;;  %v898_v28 = vpop.f32.mrb[6].mxu1 }
  0xf8   : > { %v739_v26 = vadd.f32 %v835_v62, %v724_v19  ;;  %v718_v27 = vsub.f32 %v685_v21, %v710_v18  ;;  %v560_v16 = vpop.f32.mrb[7].mxu1 }
  0xf9   : > { %v738_v32 = vadd.f32 %v835_v62, %v723_v24  ;;  %v717_v30 = vsub.f32 %v680_v25, %v709_v23  ;;  %v926_v31 = vpop.f32.mrb[6].mxu0 }
  0xfa   : > { %747 = vst [vmem:[%s1264_s15 + $0x18] sm:$0xff] %v739_v26  ;;  %v726_v20 = vmul.f32 %v984_v29, %v718_v27  ;;  %v695_v37 = vadd.f32 %v926_v31, %v898_v28  ;;  %v689_v38 = vpop.f32.mrb[7].mxu0 }
  0xfb   : > { %746 = vst [vmem:[%s1264_s15 + $0x10] sm:$0xff] %v738_v32  ;;  %v725_v40 = vmul.f32 %v986_v35, %v717_v30  ;;  %v690_v41 = vadd.f32 %v689_v38, %v560_v16 }
  0xfc   : > { %v741_v42 = vadd.f32 %v835_v62, %v726_v20  ;;  %v720_v43 = vsub.f32 %v695_v37, %v712_v36 }
  0xfd   : > { %v740_v46 = vadd.f32 %v835_v62, %v725_v40  ;;  %v719_v47 = vsub.f32 %v690_v41, %v711_v39 }
  0xfe   : > { %749 = vst [vmem:[%s1264_s15 + $0x28] sm:$0xff] %v741_v42  ;;  %v728_v33 = vmul.f32 %v988_v45, %v720_v43 }
  0xff   : > { %748 = vst [vmem:[%s1264_s15 + $0x20] sm:$0xff] %v740_v46  ;;  %v727_v49 = vmul.f32 %v990_v48, %v719_v47 }
 0x100   : > { %v743_v50 = vadd.f32 %v835_v62, %v728_v33 }
 0x101   : > { %v742_v51 = vadd.f32 %v835_v62, %v727_v49 }
 0x102   : > { %751 = vst [vmem:[%s1264_s15 + $0x38] sm:$0xff] %v743_v50 }
 0x103   : > { %750 = vst [vmem:[%s1264_s15 + $0x30] sm:$0xff] %v742_v51 }
 0x104 PF: > { %s15_s18 = sadd.s32 1, %s997_s18  }
 0x105   : > { %p12_p4 = scmp.ge.s32.totalorder %s15_s18, 4  }
 0x107   :  { %14 = sbr.rel (!%p12_p4) target bundleno = 1 (0x1), region = 70 }

</bundles_post_ra>
